<compile_context>
chip_gen: v7x
topology: tpu7x:2x2x1
jax: 0.10.0
libtpu: 0.0.40
codegen_flags: <defaults>
</compile_context>

<pallas_src>
import functools

import jax
import jax.numpy as jnp
from jax.experimental import pallas as pl
from jax.experimental.pallas import tpu as pltpu


def _round_up(x, m):
    return (x + m - 1) // m * m


def gated_dconv_kernel(x_hbm, w_ref, b_ref, o_ref, xbuf, sem, *,
                       dilation, c_pad, tile_l, win_l):
    # x_hbm : (N, Cp, Ltot) bf16 in HBM (manual DMA)
    # w_ref : (3, 2Cp, Cp)  bf16 taps-major stacked weights [conv1 ; conv2]
    # b_ref : (2Cp, 1)      f32  stacked biases
    # o_ref : (1, Cp, TL)
    # xbuf  : (2, Cp, WL)   bf16 double-buffered halo windows
    # sem   : (2,)          DMA semaphores
    d = dilation
    s = pl.program_id(0)            # L super-chunk (parallel; >1 only when N==1)
    n = pl.program_id(1)            # batch row    (parallel)
    l = pl.program_id(2)            # L tile within super-chunk (sequential)
    npl = pl.num_programs(2)
    g = s * npl + l                 # global L-tile index
    slot = l % 2

    def window_copy(tile_idx, buf_slot):
        start = pl.multiple_of(tile_idx * tile_l, 128)
        return pltpu.make_async_copy(
            x_hbm.at[n, :, pl.ds(start, win_l)], xbuf.at[buf_slot],
            sem.at[buf_slot])

    # Prime the pipeline at the start of each (super-chunk, batch-row) chain.
    @pl.when(l == 0)
    def _():
        window_copy(g, slot).start()

    # Wait for this tile's window (started at l==0 above, else prefetched at l-1).
    window_copy(g, slot).wait()

    # Prefetch the next tile's window.  The guard keeps the DMA chain strictly
    # inside this (s, n) pair, so megacore sharding of the parallel axes can
    # never leave a dangling (never-awaited) DMA.
    @pl.when(l + 1 < npl)
    def _():
        window_copy(g + 1, 1 - slot).start()

    xw = xbuf[slot]                                               # (Cp, WL) bf16
    # Three accumulating MXU matmuls (one per dilated tap) — avoids the
    # (3Cp, TL) concat materialization of the fused-K formulation.
    y = b_ref[...]                                                # (2Cp, 1) f32
    for k in range(3):
        xk = xw[:, k * d: k * d + tile_l]                         # (Cp, TL)
        y = y + jnp.dot(w_ref[k], xk, preferred_element_type=jnp.float32)
    d1 = y[:c_pad]                                                # conv1 result
    d2 = y[c_pad:]                                                # conv2 result
    # sigmoid via EUP: exp + approx reciprocal (keeps the divide off the VPU).
    gate = pl.reciprocal(1.0 + jnp.exp(-d2), approx=True)
    o_ref[0] = (d1 * gate).astype(o_ref.dtype)


def gated_dconv(x, w1, b1, w2, b2, dilation, *, compute_dtype=jnp.bfloat16,
                out_dtype=None):
    """x: (N, C, L); w*: (C, C, 3) PyTorch Conv1d layout; b*: (C,)."""
    N, C, L = x.shape
    assert w1.shape == (C, C, 3) and w2.shape == (C, C, 3), "module has C_out == C_in"
    d = int(dilation)
    out_dtype = x.dtype if out_dtype is None else out_dtype

    c_pad = _round_up(C, 16)          # bf16 sublane packing
    out_isz = jnp.dtype(out_dtype).itemsize
    cmp_isz = jnp.dtype(compute_dtype).itemsize

    # Per-TensorCore VMEM budget: 128 MiB on v5e/v6e, 64 MiB on v7x; headroom.
    try:
        vmem_cap = int(pltpu.get_tpu_info().vmem_capacity_bytes)
    except Exception:                  # conservative fallback covers v7x (64 MiB)
        vmem_cap = 64 * 1024 * 1024
    vmem_limit = min(vmem_cap * 3 // 4, 100 * 1024 * 1024)

    def footprint(tl):                 # rough per-step VMEM estimate
        wl = _round_up(tl + 2 * d, 128)
        xbuf = 2 * c_pad * wl * cmp_isz                       # x window x2 buffers
        wts = 2 * 3 * (2 * c_pad) * c_pad * cmp_isz           # weights (assume 2 bufs)
        outb = 2 * c_pad * tl * out_isz                       # output double buffer
        temps = (c_pad * wl * cmp_isz + 3 * c_pad * tl * cmp_isz
                 + 3 * (2 * c_pad) * tl * 4)                  # f32 y / d1 / d2 / gate
        return xbuf + wts + outb + temps

    # Dilation-aware tile: big enough to amortize the 2d halo and per-step
    # overhead, capped by what is needed and by the VMEM budget.
    l_needed = _round_up(max(L, 128), 128)
    tile_l = min(_round_up(max(1024, 32 * d), 128), l_needed)
    while tile_l > 128 and footprint(tile_l) > vmem_limit:
        tile_l = max(128, _round_up(tile_l // 2, 128))

    n_lt = pl.cdiv(l_needed, tile_l)
    # v7x has 2 TensorCores sharded over parallel grid axes: at batch=1, split
    # the L range into 2 parallel super-chunks so both cores get work.
    n_super = 2 if (N == 1 and n_lt >= 2) else 1
    npl = pl.cdiv(n_lt, n_super)
    n_tiles = n_super * npl
    l_out = n_tiles * tile_l
    win_l = _round_up(tile_l + 2 * d, 128)      # lane-dense halo window
    l_tot = (n_tiles - 1) * tile_l + win_l

    # Single wrapper-side pad + bf16 cast (channel pad, conv halo, lane/window
    # pad).  No halo-tile duplication: the kernel DMAs overlapping windows.
    # TODO(synk): drop this pad too by clamping DMA windows to [0, L) and
    # zeroing the edge-halo columns in-kernel with pl.when.
    x_pad = jnp.pad(x.astype(compute_dtype),
                    ((0, 0), (0, c_pad - C), (d, l_tot - d - L)))  # (N, Cp, Ltot)

    # Taps-major weight stack: W[k, o, i] = w[o, i, k]; conv1/conv2 stacked on o.
    def pack_w(w):
        wp = jnp.zeros((3, c_pad, c_pad), jnp.float32)
        wp = wp.at[:, :C, :C].set(jnp.transpose(w.astype(jnp.float32), (2, 0, 1)))
        return wp

    w_stack = jnp.concatenate([pack_w(w1), pack_w(w2)], axis=1).astype(compute_dtype)

    b_stack = jnp.zeros((2 * c_pad,), jnp.float32)
    b_stack = b_stack.at[:C].set(b1.astype(jnp.float32))
    b_stack = b_stack.at[c_pad:c_pad + C].set(b2.astype(jnp.float32))
    b_stack = b_stack.reshape(2 * c_pad, 1)

    kernel = functools.partial(gated_dconv_kernel, dilation=d, c_pad=c_pad,
                               tile_l=tile_l, win_l=win_l)

    flops = 2 * N * (2 * c_pad) * (3 * c_pad) * l_out
    bytes_accessed = (x_pad.size * x_pad.dtype.itemsize
                      + w_stack.size * w_stack.dtype.itemsize
                      + b_stack.size * b_stack.dtype.itemsize
                      + N * c_pad * l_out * out_isz)
    cost = pl.CostEstimate(flops=flops, transcendentals=N * c_pad * l_out,
                           bytes_accessed=bytes_accessed)

    def build_and_run(buffer_weights_once):
        # Buffered(1): constant-index-map (weight/bias) blocks get a single
        # resident buffer instead of the default 2, halving their VMEM cost.
        const_kw = ({"pipeline_mode": pl.Buffered(1)} if buffer_weights_once
                    else {})
        w_spec = pl.BlockSpec((3, 2 * c_pad, c_pad), lambda s, n, l: (0, 0, 0),
                              **const_kw)
        b_spec = pl.BlockSpec((2 * c_pad, 1), lambda s, n, l: (0, 0), **const_kw)
        return pl.pallas_call(
            kernel,
            out_shape=jax.ShapeDtypeStruct((N, c_pad, l_out), out_dtype),
            grid=(n_super, N, npl),
            in_specs=[
                pl.BlockSpec(memory_space=pl.ANY),   # x stays in HBM, manual DMA
                w_spec,
                b_spec,
            ],
            out_specs=pl.BlockSpec((1, c_pad, tile_l),
                                   lambda s, n, l: (n, 0, s * npl + l)),
            scratch_shapes=[
                pltpu.VMEM((2, c_pad, win_l), compute_dtype),
                pltpu.SemaphoreType.DMA((2,)),
            ],
            compiler_params=pltpu.CompilerParams(
                dimension_semantics=("parallel", "parallel", "arbitrary"),
                vmem_limit_bytes=vmem_limit),
            cost_estimate=cost,
        )(x_pad, w_stack, b_stack)

    try:
        out = build_and_run(True)
    except Exception:
        # Fallback in case pipeline_mode / Buffered(1) is unavailable in this
        # jax version; identical kernel otherwise.
        out = build_and_run(False)

    if c_pad == C and l_out == L:
        return out                      # aligned fast path: no trailing slice
    # Ragged shapes: strip the channel/lane padding (consumers that accept the
    # padded layout should take `out` directly and slice at the use site).
    return out[:, :C, :L]


def gated_dconv_ref(x, w1, b1, w2, b2, dilation):
    """Pure-JAX reference mirroring torch.nn.Conv1d semantics."""
    dn = ("NCH", "OIH", "NCH")

    def conv(w, b):
        y = jax.lax.conv_general_dilated(
            x, w, window_strides=(1,), padding=[(dilation, dilation)],
            rhs_dilation=(dilation,), dimension_numbers=dn,
            precision=jax.lax.Precision.HIGHEST)
        return y + b[None, :, None]

    return conv(w1, b1) * jax.nn.sigmoid(conv(w2, b2))


if __name__ == "__main__":
    # Small shapes consistent with the module: batch=2, channels=4, length=16, dilation=2
    N, C, L, dilation = 2, 4, 16, 2
    key = jax.random.PRNGKey(0)
    kx, k1, k2, k3, k4 = jax.random.split(key, 5)

    # Deterministic synthetic params (PyTorch-like uniform init bound = 1/sqrt(C*3))
    bound = 1.0 / (C * 3) ** 0.5
    x = jax.random.normal(kx, (N, C, L), dtype=jnp.float32)
    w1 = jax.random.uniform(k1, (C, C, 3), jnp.float32, -bound, bound)
    b1 = jax.random.uniform(k2, (C,), jnp.float32, -bound, bound)
    w2 = jax.random.uniform(k3, (C, C, 3), jnp.float32, -bound, bound)
    b2 = jax.random.uniform(k4, (C,), jnp.float32, -bound, bound)

    out = jax.block_until_ready(gated_dconv(x, w1, b1, w2, b2, dilation))

    # Reference on bf16-rounded inputs (kernel feeds the MXU bf16 with f32
    # accumulation; sigmoid uses the approx EUP reciprocal -> slightly looser tol).
    rd = lambda a: a.astype(jnp.bfloat16).astype(jnp.float32)
    ref = gated_dconv_ref(rd(x), rd(w1), b1, rd(w2), b2, dilation)

    assert out.shape == (N, C, L)
    err = float(jnp.max(jnp.abs(out - ref)))
    assert err < 5e-3, f"mismatch vs reference: max abs err {err}"
    print("KERNEL_OK")
</pallas_src>

<mosaic_0001>
module attributes {stable_mosaic.version = 11 : i64} {
  func.func @gated_dconv_kernel(%arg0: i32, %arg1: i32, %arg2: i32, %arg3: memref<2x16x256xbf16, #tpu.memory_space<any>>, %arg4: memref<3x32x16xbf16, #tpu.memory_space<vmem>>, %arg5: memref<32x1xf32, #tpu.memory_space<vmem>>, %arg6: memref<1x16x128xf32, #tpu.memory_space<vmem>>, %arg7: memref<2x16x256xbf16, #tpu.memory_space<vmem>>, %arg8: memref<2x!tpu.dma_semaphore, #tpu.memory_space<semaphore_mem>>) attributes {dimension_semantics = [#tpu.dimension_semantics<parallel>, #tpu.dimension_semantics<parallel>, #tpu.dimension_semantics<arbitrary>], iteration_bounds = array<i64: 1, 2, 1>, scalar_prefetch = 0 : i64, scratch_operands = 2 : i64, tpu.core_type = #tpu.core_type<tc>, window_params = [{}, {pipeline_mode = #tpu.pipeline_mode<synchronous>, transform_indices = @transform_1, window_bounds = array<i64: 3, 32, 16>}, {pipeline_mode = #tpu.pipeline_mode<synchronous>, transform_indices = @transform_2, window_bounds = array<i64: 32, 1>}, {transform_indices = @transform_3, window_bounds = array<i64: 1, 16, 128>}]} {
    %c1_i32 = arith.constant 1 : i32
    %0 = arith.muli %arg0, %c1_i32 : i32
    %1 = arith.addi %0, %arg2 : i32
    %c2_i32 = arith.constant 2 : i32
    %c0_i32 = arith.constant 0 : i32
    %2 = arith.cmpi eq, %c2_i32, %c0_i32 : i32
    %c1_i32_0 = arith.constant 1 : i32
    %3 = arith.select %2, %c1_i32_0, %c2_i32 : i32
    %4 = arith.remsi %arg2, %3 : i32
    %c0_i32_1 = arith.constant 0 : i32
    %5 = arith.cmpi ne, %4, %c0_i32_1 : i32
    %c0_i32_2 = arith.constant 0 : i32
    %6 = arith.cmpi slt, %4, %c0_i32_2 : i32
    %c0_i32_3 = arith.constant 0 : i32
    %7 = arith.cmpi slt, %3, %c0_i32_3 : i32
    %8 = arith.xori %6, %7 : i1
    %9 = arith.andi %8, %5 : i1
    %10 = arith.addi %4, %3 : i32
    %11 = arith.select %9, %10, %4 : i32
    %c0_i32_4 = arith.constant 0 : i32
    %12 = arith.cmpi eq, %arg2, %c0_i32_4 : i32
    %13 = arith.extui %12 : i1 to i32
    %c0_i32_5 = arith.constant 0 : i32
    %14 = arith.cmpi ne, %13, %c0_i32_5 : i32
    scf.if %14 {
      %c128_i32_29 = arith.constant 128 : i32
      %59 = arith.muli %1, %c128_i32_29 : i32
      %60 = tpu.assume_multiple %59, 128 : i32
      %c0_i32_30 = arith.constant 0 : i32
      %61 = tpu.memref_slice %arg3[%arg1, %c0_i32_30, %60] : memref<2x16x256xbf16, #tpu.memory_space<any>> -> memref<1x16x256xbf16, #tpu.memory_space<any>>
      %62 = tpu.memref_squeeze %61 : memref<1x16x256xbf16, #tpu.memory_space<any>> -> memref<16x256xbf16, #tpu.memory_space<any>>
      %c0_i32_31 = arith.constant 0 : i32
      %c0_i32_32 = arith.constant 0 : i32
      %63 = tpu.memref_slice %arg7[%11, %c0_i32_31, %c0_i32_32] : memref<2x16x256xbf16, #tpu.memory_space<vmem>> -> memref<1x16x256xbf16, #tpu.memory_space<vmem>>
      %64 = tpu.memref_squeeze %63 : memref<1x16x256xbf16, #tpu.memory_space<vmem>> -> memref<16x256xbf16, #tpu.memory_space<vmem>>
      %65 = tpu.memref_slice %arg8[%11] : memref<2x!tpu.dma_semaphore, #tpu.memory_space<semaphore_mem>> -> memref<1x!tpu.dma_semaphore, #tpu.memory_space<semaphore_mem>>
      %66 = tpu.memref_squeeze %65 : memref<1x!tpu.dma_semaphore, #tpu.memory_space<semaphore_mem>> -> memref<!tpu.dma_semaphore, #tpu.memory_space<semaphore_mem>>
      tpu.enqueue_dma source(%62 : memref<16x256xbf16, #tpu.memory_space<any>>) target(%64 : memref<16x256xbf16, #tpu.memory_space<vmem>>) target_semaphore(%66 : memref<!tpu.dma_semaphore, #tpu.memory_space<semaphore_mem>>)
    } else {
    }
    %c128_i32 = arith.constant 128 : i32
    %15 = arith.muli %1, %c128_i32 : i32
    %16 = tpu.assume_multiple %15, 128 : i32
    %c0_i32_6 = arith.constant 0 : i32
    %17 = tpu.memref_slice %arg3[%arg1, %c0_i32_6, %16] : memref<2x16x256xbf16, #tpu.memory_space<any>> -> memref<1x16x256xbf16, #tpu.memory_space<any>>
    %18 = tpu.memref_squeeze %17 : memref<1x16x256xbf16, #tpu.memory_space<any>> -> memref<16x256xbf16, #tpu.memory_space<any>>
    %c0_i32_7 = arith.constant 0 : i32
    %c0_i32_8 = arith.constant 0 : i32
    %19 = tpu.memref_slice %arg7[%11, %c0_i32_7, %c0_i32_8] : memref<2x16x256xbf16, #tpu.memory_space<vmem>> -> memref<1x16x256xbf16, #tpu.memory_space<vmem>>
    %20 = tpu.memref_squeeze %19 : memref<1x16x256xbf16, #tpu.memory_space<vmem>> -> memref<16x256xbf16, #tpu.memory_space<vmem>>
    %21 = tpu.memref_slice %arg8[%11] : memref<2x!tpu.dma_semaphore, #tpu.memory_space<semaphore_mem>> -> memref<1x!tpu.dma_semaphore, #tpu.memory_space<semaphore_mem>>
    %22 = tpu.memref_squeeze %21 : memref<1x!tpu.dma_semaphore, #tpu.memory_space<semaphore_mem>> -> memref<!tpu.dma_semaphore, #tpu.memory_space<semaphore_mem>>
    tpu.wait_dma2 semaphore(%22 : memref<!tpu.dma_semaphore, #tpu.memory_space<semaphore_mem>>) src(%18 : memref<16x256xbf16, #tpu.memory_space<any>>) dst(%20 : memref<16x256xbf16, #tpu.memory_space<vmem>>)
    %c1_i32_9 = arith.constant 1 : i32
    %23 = arith.addi %arg2, %c1_i32_9 : i32
    %c1_i32_10 = arith.constant 1 : i32
    %24 = arith.cmpi slt, %23, %c1_i32_10 : i32
    %25 = arith.extui %24 : i1 to i32
    %c0_i32_11 = arith.constant 0 : i32
    %26 = arith.cmpi ne, %25, %c0_i32_11 : i32
    scf.if %26 {
      %c1_i32_29 = arith.constant 1 : i32
      %59 = arith.addi %1, %c1_i32_29 : i32
      %c1_i32_30 = arith.constant 1 : i32
      %60 = arith.subi %c1_i32_30, %11 : i32
      %c128_i32_31 = arith.constant 128 : i32
      %61 = arith.muli %59, %c128_i32_31 : i32
      %62 = tpu.assume_multiple %61, 128 : i32
      %c0_i32_32 = arith.constant 0 : i32
      %63 = tpu.memref_slice %arg3[%arg1, %c0_i32_32, %62] : memref<2x16x256xbf16, #tpu.memory_space<any>> -> memref<1x16x256xbf16, #tpu.memory_space<any>>
      %64 = tpu.memref_squeeze %63 : memref<1x16x256xbf16, #tpu.memory_space<any>> -> memref<16x256xbf16, #tpu.memory_space<any>>
      %c0_i32_33 = arith.constant 0 : i32
      %c0_i32_34 = arith.constant 0 : i32
      %65 = tpu.memref_slice %arg7[%60, %c0_i32_33, %c0_i32_34] : memref<2x16x256xbf16, #tpu.memory_space<vmem>> -> memref<1x16x256xbf16, #tpu.memory_space<vmem>>
      %66 = tpu.memref_squeeze %65 : memref<1x16x256xbf16, #tpu.memory_space<vmem>> -> memref<16x256xbf16, #tpu.memory_space<vmem>>
      %67 = tpu.memref_slice %arg8[%60] : memref<2x!tpu.dma_semaphore, #tpu.memory_space<semaphore_mem>> -> memref<1x!tpu.dma_semaphore, #tpu.memory_space<semaphore_mem>>
      %68 = tpu.memref_squeeze %67 : memref<1x!tpu.dma_semaphore, #tpu.memory_space<semaphore_mem>> -> memref<!tpu.dma_semaphore, #tpu.memory_space<semaphore_mem>>
      tpu.enqueue_dma source(%64 : memref<16x256xbf16, #tpu.memory_space<any>>) target(%66 : memref<16x256xbf16, #tpu.memory_space<vmem>>) target_semaphore(%68 : memref<!tpu.dma_semaphore, #tpu.memory_space<semaphore_mem>>)
    } else {
    }
    %27 = arith.index_cast %11 : i32 to index
    %c0 = arith.constant 0 : index
    %c0_12 = arith.constant 0 : index
    %28 = vector.load %arg7[%27, %c0, %c0_12] : memref<2x16x256xbf16, #tpu.memory_space<vmem>>, vector<1x16x256xbf16>
    %29 = vector.shape_cast %28 : vector<1x16x256xbf16> to vector<16x256xbf16>
    %c0_13 = arith.constant 0 : index
    %c0_14 = arith.constant 0 : index
    %30 = vector.load %arg5[%c0_13, %c0_14] : memref<32x1xf32, #tpu.memory_space<vmem>>, vector<32x1xf32>
    %31 = vector.extract_strided_slice %29 {offsets = [0, 0], sizes = [16, 128], strides = [1, 1]} : vector<16x256xbf16> to vector<16x128xbf16>
    %c0_15 = arith.constant 0 : index
    %c0_16 = arith.constant 0 : index
    %c0_17 = arith.constant 0 : index
    %32 = vector.load %arg4[%c0_15, %c0_16, %c0_17] : memref<3x32x16xbf16, #tpu.memory_space<vmem>>, vector<1x32x16xbf16>
    %33 = vector.shape_cast %32 : vector<1x32x16xbf16> to vector<32x16xbf16>
    %cst = arith.constant dense<0.000000e+00> : vector<32x128xf32>
    %34 = tpu.matmul %33, %31, %cst {dimension_numbers = #tpu.dot_dimension_numbers<[1], [0], [0], [1], [0, 0, 1, 1], [], []>} : vector<32x16xbf16>, vector<16x128xbf16>, vector<32x128xf32> -> vector<32x128xf32>
    %35 = vector.broadcast %30 : vector<32x1xf32> to vector<32x128xf32>
    %36 = arith.addf %35, %34 : vector<32x128xf32>
    %37 = vector.extract_strided_slice %29 {offsets = [0, 2], sizes = [16, 128], strides = [1, 1]} : vector<16x256xbf16> to vector<16x128xbf16>
    %c1 = arith.constant 1 : index
    %c0_18 = arith.constant 0 : index
    %c0_19 = arith.constant 0 : index
    %38 = vector.load %arg4[%c1, %c0_18, %c0_19] : memref<3x32x16xbf16, #tpu.memory_space<vmem>>, vector<1x32x16xbf16>
    %39 = vector.shape_cast %38 : vector<1x32x16xbf16> to vector<32x16xbf16>
    %cst_20 = arith.constant dense<0.000000e+00> : vector<32x128xf32>
    %40 = tpu.matmul %39, %37, %cst_20 {dimension_numbers = #tpu.dot_dimension_numbers<[1], [0], [0], [1], [0, 0, 1, 1], [], []>} : vector<32x16xbf16>, vector<16x128xbf16>, vector<32x128xf32> -> vector<32x128xf32>
    %41 = arith.addf %36, %40 : vector<32x128xf32>
    %42 = vector.extract_strided_slice %29 {offsets = [0, 4], sizes = [16, 128], strides = [1, 1]} : vector<16x256xbf16> to vector<16x128xbf16>
    %c2 = arith.constant 2 : index
    %c0_21 = arith.constant 0 : index
    %c0_22 = arith.constant 0 : index
    %43 = vector.load %arg4[%c2, %c0_21, %c0_22] : memref<3x32x16xbf16, #tpu.memory_space<vmem>>, vector<1x32x16xbf16>
    %44 = vector.shape_cast %43 : vector<1x32x16xbf16> to vector<32x16xbf16>
    %cst_23 = arith.constant dense<0.000000e+00> : vector<32x128xf32>
    %45 = tpu.matmul %44, %42, %cst_23 {dimension_numbers = #tpu.dot_dimension_numbers<[1], [0], [0], [1], [0, 0, 1, 1], [], []>} : vector<32x16xbf16>, vector<16x128xbf16>, vector<32x128xf32> -> vector<32x128xf32>
    %46 = arith.addf %41, %45 : vector<32x128xf32>
    %47 = vector.extract_strided_slice %46 {offsets = [0, 0], sizes = [16, 128], strides = [1, 1]} : vector<32x128xf32> to vector<16x128xf32>
    %48 = vector.extract_strided_slice %46 {offsets = [16, 0], sizes = [16, 128], strides = [1, 1]} : vector<32x128xf32> to vector<16x128xf32>
    %cst_24 = arith.constant 0.000000e+00 : f32
    %49 = vector.broadcast %cst_24 : f32 to vector<16x128xf32>
    %50 = arith.subf %49, %48 : vector<16x128xf32>
    %51 = math.exp %50 : vector<16x128xf32>
    %cst_25 = arith.constant 1.000000e+00 : f32
    %52 = vector.broadcast %cst_25 : f32 to vector<16x128xf32>
    %53 = arith.addf %52, %51 : vector<16x128xf32>
    %54 = tpu.reciprocal %53 {approx = true} : vector<16x128xf32> -> vector<16x128xf32>
    %55 = arith.mulf %47, %54 : vector<16x128xf32>
    %c0_26 = arith.constant 0 : index
    %c0_27 = arith.constant 0 : index
    %c0_28 = arith.constant 0 : index
    %56 = vector.load %arg6[%c0_26, %c0_27, %c0_28] : memref<1x16x128xf32, #tpu.memory_space<vmem>>, vector<1x16x128xf32>
    %57 = vector.shape_cast %56 : vector<1x16x128xf32> to vector<16x128xf32>
    %58 = vector.shape_cast %55 : vector<16x128xf32> to vector<1x16x128xf32>
    tpu.vector_store %arg6[%c0_26, %c0_27, %c0_28], %58 {strides = array<i32>} : memref<1x16x128xf32, #tpu.memory_space<vmem>>, vector<1x16x128xf32>,
    return
  }
  func.func @transform_1(%arg0: i32, %arg1: i32, %arg2: i32) -> (i32, i32, i32) {
    %c0_i32 = arith.constant 0 : i32
    %c0_i32_0 = arith.constant 0 : i32
    %c0_i32_1 = arith.constant 0 : i32
    %c0_i32_2 = arith.constant 0 : i32
    return %c0_i32, %c0_i32_0, %c0_i32_1 : i32, i32, i32
  }
  func.func @transform_2(%arg0: i32, %arg1: i32, %arg2: i32) -> (i32, i32) {
    %c0_i32 = arith.constant 0 : i32
    %c0_i32_0 = arith.constant 0 : i32
    %c0_i32_1 = arith.constant 0 : i32
    return %c0_i32, %c0_i32_0 : i32, i32
  }
  func.func @transform_3(%arg0: i32, %arg1: i32, %arg2: i32) -> (i32, i32, i32) {
    %c1_i32 = arith.constant 1 : i32
    %0 = arith.muli %arg0, %c1_i32 : i32
    %1 = arith.addi %0, %arg2 : i32
    %c0_i32 = arith.constant 0 : i32
    %c0_i32_0 = arith.constant 0 : i32
    return %arg1, %c0_i32, %1 : i32, i32, i32
  }
}

module attributes {stable_mosaic.version = 11 : i64} {
  func.func @gated_dconv_kernel(%arg0: i32, %arg1: i32, %arg2: i32, %arg3: memref<2x16x256xbf16, #tpu.memory_space<any>>, %arg4: memref<3x32x16xbf16, #tpu.memory_space<vmem>>, %arg5: memref<32x1xf32, #tpu.memory_space<vmem>>, %arg6: memref<1x16x128xf32, #tpu.memory_space<vmem>>, %arg7: memref<2x16x256xbf16, #tpu.memory_space<vmem>>, %arg8: memref<2x!tpu.dma_semaphore, #tpu.memory_space<semaphore_mem>>) attributes {dimension_semantics = [#tpu.dimension_semantics<parallel>, #tpu.dimension_semantics<parallel>, #tpu.dimension_semantics<arbitrary>], iteration_bounds = array<i64: 1, 2, 1>, scalar_prefetch = 0 : i64, scratch_operands = 2 : i64, tpu.core_type = #tpu.core_type<tc>, window_params = [{}, {pipeline_mode = #tpu.pipeline_mode<synchronous>, transform_indices = @transform_1, window_bounds = array<i64: 3, 32, 16>}, {pipeline_mode = #tpu.pipeline_mode<synchronous>, transform_indices = @transform_2, window_bounds = array<i64: 32, 1>}, {transform_indices = @transform_3, window_bounds = array<i64: 1, 16, 128>}]} {
    %c1_i32 = arith.constant 1 : i32
    %0 = arith.muli %arg0, %c1_i32 : i32
    %1 = arith.addi %0, %arg2 : i32
    %c2_i32 = arith.constant 2 : i32
    %c0_i32 = arith.constant 0 : i32
    %2 = arith.cmpi eq, %c2_i32, %c0_i32 : i32
    %c1_i32_0 = arith.constant 1 : i32
    %3 = arith.select %2, %c1_i32_0, %c2_i32 : i32
    %4 = arith.remsi %arg2, %3 : i32
    %c0_i32_1 = arith.constant 0 : i32
    %5 = arith.cmpi ne, %4, %c0_i32_1 : i32
    %c0_i32_2 = arith.constant 0 : i32
    %6 = arith.cmpi slt, %4, %c0_i32_2 : i32
    %c0_i32_3 = arith.constant 0 : i32
    %7 = arith.cmpi slt, %3, %c0_i32_3 : i32
    %8 = arith.xori %6, %7 : i1
    %9 = arith.andi %8, %5 : i1
    %10 = arith.addi %4, %3 : i32
    %11 = arith.select %9, %10, %4 : i32
    %c0_i32_4 = arith.constant 0 : i32
    %12 = arith.cmpi eq, %arg2, %c0_i32_4 : i32
    %13 = arith.extui %12 : i1 to i32
    %c0_i32_5 = arith.constant 0 : i32
    %14 = arith.cmpi ne, %13, %c0_i32_5 : i32
    scf.if %14 {
      %c128_i32_29 = arith.constant 128 : i32
      %59 = arith.muli %1, %c128_i32_29 : i32
      %60 = tpu.assume_multiple %59, 128 : i32
      %c0_i32_30 = arith.constant 0 : i32
      %61 = tpu.memref_slice %arg3[%arg1, %c0_i32_30, %60] : memref<2x16x256xbf16, #tpu.memory_space<any>> -> memref<1x16x256xbf16, #tpu.memory_space<any>>
      %62 = tpu.memref_squeeze %61 : memref<1x16x256xbf16, #tpu.memory_space<any>> -> memref<16x256xbf16, #tpu.memory_space<any>>
      %c0_i32_31 = arith.constant 0 : i32
      %c0_i32_32 = arith.constant 0 : i32
      %63 = tpu.memref_slice %arg7[%11, %c0_i32_31, %c0_i32_32] : memref<2x16x256xbf16, #tpu.memory_space<vmem>> -> memref<1x16x256xbf16, #tpu.memory_space<vmem>>
      %64 = tpu.memref_squeeze %63 : memref<1x16x256xbf16, #tpu.memory_space<vmem>> -> memref<16x256xbf16, #tpu.memory_space<vmem>>
      %65 = tpu.memref_slice %arg8[%11] : memref<2x!tpu.dma_semaphore, #tpu.memory_space<semaphore_mem>> -> memref<1x!tpu.dma_semaphore, #tpu.memory_space<semaphore_mem>>
      %66 = tpu.memref_squeeze %65 : memref<1x!tpu.dma_semaphore, #tpu.memory_space<semaphore_mem>> -> memref<!tpu.dma_semaphore, #tpu.memory_space<semaphore_mem>>
      tpu.enqueue_dma source(%62 : memref<16x256xbf16, #tpu.memory_space<any>>) target(%64 : memref<16x256xbf16, #tpu.memory_space<vmem>>) target_semaphore(%66 : memref<!tpu.dma_semaphore, #tpu.memory_space<semaphore_mem>>)
    } else {
    }
    %c128_i32 = arith.constant 128 : i32
    %15 = arith.muli %1, %c128_i32 : i32
    %16 = tpu.assume_multiple %15, 128 : i32
    %c0_i32_6 = arith.constant 0 : i32
    %17 = tpu.memref_slice %arg3[%arg1, %c0_i32_6, %16] : memref<2x16x256xbf16, #tpu.memory_space<any>> -> memref<1x16x256xbf16, #tpu.memory_space<any>>
    %18 = tpu.memref_squeeze %17 : memref<1x16x256xbf16, #tpu.memory_space<any>> -> memref<16x256xbf16, #tpu.memory_space<any>>
    %c0_i32_7 = arith.constant 0 : i32
    %c0_i32_8 = arith.constant 0 : i32
    %19 = tpu.memref_slice %arg7[%11, %c0_i32_7, %c0_i32_8] : memref<2x16x256xbf16, #tpu.memory_space<vmem>> -> memref<1x16x256xbf16, #tpu.memory_space<vmem>>
    %20 = tpu.memref_squeeze %19 : memref<1x16x256xbf16, #tpu.memory_space<vmem>> -> memref<16x256xbf16, #tpu.memory_space<vmem>>
    %21 = tpu.memref_slice %arg8[%11] : memref<2x!tpu.dma_semaphore, #tpu.memory_space<semaphore_mem>> -> memref<1x!tpu.dma_semaphore, #tpu.memory_space<semaphore_mem>>
    %22 = tpu.memref_squeeze %21 : memref<1x!tpu.dma_semaphore, #tpu.memory_space<semaphore_mem>> -> memref<!tpu.dma_semaphore, #tpu.memory_space<semaphore_mem>>
    tpu.wait_dma2 semaphore(%22 : memref<!tpu.dma_semaphore, #tpu.memory_space<semaphore_mem>>) src(%18 : memref<16x256xbf16, #tpu.memory_space<any>>) dst(%20 : memref<16x256xbf16, #tpu.memory_space<vmem>>)
    %c1_i32_9 = arith.constant 1 : i32
    %23 = arith.addi %arg2, %c1_i32_9 : i32
    %c1_i32_10 = arith.constant 1 : i32
    %24 = arith.cmpi slt, %23, %c1_i32_10 : i32
    %25 = arith.extui %24 : i1 to i32
    %c0_i32_11 = arith.constant 0 : i32
    %26 = arith.cmpi ne, %25, %c0_i32_11 : i32
    scf.if %26 {
      %c1_i32_29 = arith.constant 1 : i32
      %59 = arith.addi %1, %c1_i32_29 : i32
      %c1_i32_30 = arith.constant 1 : i32
      %60 = arith.subi %c1_i32_30, %11 : i32
      %c128_i32_31 = arith.constant 128 : i32
      %61 = arith.muli %59, %c128_i32_31 : i32
      %62 = tpu.assume_multiple %61, 128 : i32
      %c0_i32_32 = arith.constant 0 : i32
      %63 = tpu.memref_slice %arg3[%arg1, %c0_i32_32, %62] : memref<2x16x256xbf16, #tpu.memory_space<any>> -> memref<1x16x256xbf16, #tpu.memory_space<any>>
      %64 = tpu.memref_squeeze %63 : memref<1x16x256xbf16, #tpu.memory_space<any>> -> memref<16x256xbf16, #tpu.memory_space<any>>
      %c0_i32_33 = arith.constant 0 : i32
      %c0_i32_34 = arith.constant 0 : i32
      %65 = tpu.memref_slice %arg7[%60, %c0_i32_33, %c0_i32_34] : memref<2x16x256xbf16, #tpu.memory_space<vmem>> -> memref<1x16x256xbf16, #tpu.memory_space<vmem>>
      %66 = tpu.memref_squeeze %65 : memref<1x16x256xbf16, #tpu.memory_space<vmem>> -> memref<16x256xbf16, #tpu.memory_space<vmem>>
      %67 = tpu.memref_slice %arg8[%60] : memref<2x!tpu.dma_semaphore, #tpu.memory_space<semaphore_mem>> -> memref<1x!tpu.dma_semaphore, #tpu.memory_space<semaphore_mem>>
      %68 = tpu.memref_squeeze %67 : memref<1x!tpu.dma_semaphore, #tpu.memory_space<semaphore_mem>> -> memref<!tpu.dma_semaphore, #tpu.memory_space<semaphore_mem>>
      tpu.enqueue_dma source(%64 : memref<16x256xbf16, #tpu.memory_space<any>>) target(%66 : memref<16x256xbf16, #tpu.memory_space<vmem>>) target_semaphore(%68 : memref<!tpu.dma_semaphore, #tpu.memory_space<semaphore_mem>>)
    } else {
    }
    %27 = arith.index_cast %11 : i32 to index
    %c0 = arith.constant 0 : index
    %c0_12 = arith.constant 0 : index
    %28 = vector.load %arg7[%27, %c0, %c0_12] : memref<2x16x256xbf16, #tpu.memory_space<vmem>>, vector<1x16x256xbf16>
    %29 = vector.shape_cast %28 : vector<1x16x256xbf16> to vector<16x256xbf16>
    %c0_13 = arith.constant 0 : index
    %c0_14 = arith.constant 0 : index
    %30 = vector.load %arg5[%c0_13, %c0_14] : memref<32x1xf32, #tpu.memory_space<vmem>>, vector<32x1xf32>
    %31 = vector.extract_strided_slice %29 {offsets = [0, 0], sizes = [16, 128], strides = [1, 1]} : vector<16x256xbf16> to vector<16x128xbf16>
    %c0_15 = arith.constant 0 : index
    %c0_16 = arith.constant 0 : index
    %c0_17 = arith.constant 0 : index
    %32 = vector.load %arg4[%c0_15, %c0_16, %c0_17] : memref<3x32x16xbf16, #tpu.memory_space<vmem>>, vector<1x32x16xbf16>
    %33 = vector.shape_cast %32 : vector<1x32x16xbf16> to vector<32x16xbf16>
    %cst = arith.constant dense<0.000000e+00> : vector<32x128xf32>
    %34 = tpu.matmul %33, %31, %cst {dimension_numbers = #tpu.dot_dimension_numbers<[1], [0], [0], [1], [0, 0, 1, 1], [], []>} : vector<32x16xbf16>, vector<16x128xbf16>, vector<32x128xf32> -> vector<32x128xf32>
    %35 = vector.broadcast %30 : vector<32x1xf32> to vector<32x128xf32>
    %36 = arith.addf %35, %34 : vector<32x128xf32>
    %37 = vector.extract_strided_slice %29 {offsets = [0, 2], sizes = [16, 128], strides = [1, 1]} : vector<16x256xbf16> to vector<16x128xbf16>
    %c1 = arith.constant 1 : index
    %c0_18 = arith.constant 0 : index
    %c0_19 = arith.constant 0 : index
    %38 = vector.load %arg4[%c1, %c0_18, %c0_19] : memref<3x32x16xbf16, #tpu.memory_space<vmem>>, vector<1x32x16xbf16>
    %39 = vector.shape_cast %38 : vector<1x32x16xbf16> to vector<32x16xbf16>
    %cst_20 = arith.constant dense<0.000000e+00> : vector<32x128xf32>
    %40 = tpu.matmul %39, %37, %cst_20 {dimension_numbers = #tpu.dot_dimension_numbers<[1], [0], [0], [1], [0, 0, 1, 1], [], []>} : vector<32x16xbf16>, vector<16x128xbf16>, vector<32x128xf32> -> vector<32x128xf32>
    %41 = arith.addf %36, %40 : vector<32x128xf32>
    %42 = vector.extract_strided_slice %29 {offsets = [0, 4], sizes = [16, 128], strides = [1, 1]} : vector<16x256xbf16> to vector<16x128xbf16>
    %c2 = arith.constant 2 : index
    %c0_21 = arith.constant 0 : index
    %c0_22 = arith.constant 0 : index
    %43 = vector.load %arg4[%c2, %c0_21, %c0_22] : memref<3x32x16xbf16, #tpu.memory_space<vmem>>, vector<1x32x16xbf16>
    %44 = vector.shape_cast %43 : vector<1x32x16xbf16> to vector<32x16xbf16>
    %cst_23 = arith.constant dense<0.000000e+00> : vector<32x128xf32>
    %45 = tpu.matmul %44, %42, %cst_23 {dimension_numbers = #tpu.dot_dimension_numbers<[1], [0], [0], [1], [0, 0, 1, 1], [], []>} : vector<32x16xbf16>, vector<16x128xbf16>, vector<32x128xf32> -> vector<32x128xf32>
    %46 = arith.addf %41, %45 : vector<32x128xf32>
    %47 = vector.extract_strided_slice %46 {offsets = [0, 0], sizes = [16, 128], strides = [1, 1]} : vector<32x128xf32> to vector<16x128xf32>
    %48 = vector.extract_strided_slice %46 {offsets = [16, 0], sizes = [16, 128], strides = [1, 1]} : vector<32x128xf32> to vector<16x128xf32>
    %cst_24 = arith.constant 0.000000e+00 : f32
    %49 = vector.broadcast %cst_24 : f32 to vector<16x128xf32>
    %50 = arith.subf %49, %48 : vector<16x128xf32>
    %51 = math.exp %50 : vector<16x128xf32>
    %cst_25 = arith.constant 1.000000e+00 : f32
    %52 = vector.broadcast %cst_25 : f32 to vector<16x128xf32>
    %53 = arith.addf %52, %51 : vector<16x128xf32>
    %54 = tpu.reciprocal %53 {approx = true} : vector<16x128xf32> -> vector<16x128xf32>
    %55 = arith.mulf %47, %54 : vector<16x128xf32>
    %c0_26 = arith.constant 0 : index
    %c0_27 = arith.constant 0 : index
    %c0_28 = arith.constant 0 : index
    %56 = vector.load %arg6[%c0_26, %c0_27, %c0_28] : memref<1x16x128xf32, #tpu.memory_space<vmem>>, vector<1x16x128xf32>
    %57 = vector.shape_cast %56 : vector<1x16x128xf32> to vector<16x128xf32>
    %58 = vector.shape_cast %55 : vector<16x128xf32> to vector<1x16x128xf32>
    tpu.vector_store %arg6[%c0_26, %c0_27, %c0_28], %58 {strides = array<i32>} : memref<1x16x128xf32, #tpu.memory_space<vmem>>, vector<1x16x128xf32>,
    return
  }
  func.func @transform_1(%arg0: i32, %arg1: i32, %arg2: i32) -> (i32, i32, i32) {
    %c0_i32 = arith.constant 0 : i32
    %c0_i32_0 = arith.constant 0 : i32
    %c0_i32_1 = arith.constant 0 : i32
    %c0_i32_2 = arith.constant 0 : i32
    return %c0_i32, %c0_i32_0, %c0_i32_1 : i32, i32, i32
  }
  func.func @transform_2(%arg0: i32, %arg1: i32, %arg2: i32) -> (i32, i32) {
    %c0_i32 = arith.constant 0 : i32
    %c0_i32_0 = arith.constant 0 : i32
    %c0_i32_1 = arith.constant 0 : i32
    return %c0_i32, %c0_i32_0 : i32, i32
  }
  func.func @transform_3(%arg0: i32, %arg1: i32, %arg2: i32) -> (i32, i32, i32) {
    %c1_i32 = arith.constant 1 : i32
    %0 = arith.muli %arg0, %c1_i32 : i32
    %1 = arith.addi %0, %arg2 : i32
    %c0_i32 = arith.constant 0 : i32
    %c0_i32_0 = arith.constant 0 : i32
    return %arg1, %c0_i32, %1 : i32, i32, i32
  }
}

</mosaic_0001>

<bundles_post_ra>
// kernel: tpu_custom_call.1
= control target key start
LH: loop header
LB: loop body
LE: loop exit
PB: predicated region body
PF: predicated region fallthrough
CT: control target
= control target key end

     0   :  { %8 = vsyncpa [#allocation5], 0  ;;  %s1177_s0 = inlined_call_operand.vmem [shape: bf16[2,16,256], index: 0, kind: input, shape index: {}]   ;;  %s1178_s1 = inlined_call_operand.vmem [shape: bf16[3,32,16], index: 1, kind: input, shape index: {}]   ;;  %s1179_s2 = inlined_call_operand.vmem [shape: f32[32,1], index: 2, kind: input, shape index: {}]   ;;  %s1180_s3 = inlined_call_operand.hbm [shape: f32[2,16,128], index: 3, kind: output, shape index: {}]  }
   0x1   :  { %10 = vsyncpa [#allocation5 + $0x1], 0  ;;  %s1018_s12 = smov 0   ;;  %s1020_s13 = smov 0  }
   0x2   :  { %s1022_s14 = smov 0   ;;  %s1024_s15 = smov 0  }
   0x3   :  { %s1026_s16 = smov 0   ;;  %s1028_s17 = smov 0  }
   0x4 LB: > { %s747_s18 = sadd.s32 4294967295, %s990_s17   ;;  %s748_s19 = sadd.s32 4294967294, %s990_s17   ;;  %s990_s17 = sphi %s1028_s17, %s16_s17   ;;  %s986_s16 = sphi %s1026_s16, %s1187_s16   ;;  %s982_s15 = sphi %s1024_s15, %s1186_s15   ;;  %s978_s14 = sphi %s1022_s14, %s1185_s14   ;;  %s974_s13 = sphi %s1020_s13, %s1184_s13   ;;  %s970_s12 = sphi %s1018_s12, %s1183_s12  }
   0x5   : > { %s31_s20 = sadd.s32 1, %s986_s16  ;;  %s88_s21 = sadd.s32 1, %s978_s14 }
   0x6   : > { %p33_p0 = scmp.ge.s32.totalorder %s31_s20, 2  ;;  %p98_p1 = scmp.ne.s32.totalorder %s978_s14, %s974_s13 }
   0x7   : > { %p99_p2 = scmp.eq.s32.totalorder %s747_s18, 1  ;;  %p104_p3 = scmp.ne.s32.totalorder %s974_s13, %s970_s12 }
   0x8   : > { %s1189_s20 = smov (%p33_p0, %s31_s20), 0  ;;  %p105_p5 = scmp.eq.s32.totalorder %s748_s19, 1 }
   0x9   : > { %p1058_p4 = por %p99_p2, %p98_p1  ;;  %s83_s23 = ssub.s32 %s986_s16, %s1189_s20 }
   0xa   : > { %p750_p6 = scmp.ge.s32.totalorder %s990_s17, 1  ;;  %p86_p7 = scmp.eq.s32.totalorder %s83_s23, 0 }
   0xb   : > { %p1065_p8 = por %p105_p5, %p104_p3  ;;  %p129_p9 = scmp.lt.s32.totalorder %s990_s17, 3 }
   0xc   : > { %s1071_s25 = scalar_select %p86_p7, %s978_s14, %s88_s21  }
   0xd   : > { %p130_p10 = pnand %p750_p6, %p129_p9 }
   0xe   : > { %s143_s26 = sand.u32 (!%p130_p10), 1, %s974_s13   ;;  %s791_s27 = sshll.u32 (!%p130_p10), %s982_s15, 4 }
   0xf   : > { %133 = sbr.rel (%p130_p10) target bundleno = 423 (0x1a7), region = 28  ;;  %s751_s28 = sshll.u32 (!%p130_p10), %s143_s26, 4 }
  0x10   : > { %s171_s4 = scalar_lea.vmem (!%p130_p10), %s1177_s0, %s791_s27  ;;  %s1080_s5 = scalar_lea.vmem (!%p130_p10), [#allocation4], %s751_s28 }
  0x11   : > { %v193_v0 = vld [vmem:[%s171_s4] sm:$0xf] (!%p130_p10)  ;;  %v195_v1 = vld [vmem:[%s171_s4 + $0x8] sm:$0xf] (!%p130_p10)  ;;  %v197_v2 = vld [vmem:[%s171_s4 + $0x4] sm:$0xf] (!%p130_p10) }
  0x12   : > { %194 = vst [vmem:[#allocation2] sm:$0xf] (!%p130_p10), %v193_v0  ;;  %196 = vst [vmem:[#allocation2 + $0x4] sm:$0xf] (!%p130_p10), %v195_v1  ;;  %v199_v3 = vld [vmem:[%s171_s4 + $0xc] sm:$0xf] (!%p130_p10) }
  0x13   : > { %198 = vst [vmem:[#allocation2 + $0x8] sm:$0xf] (!%p130_p10), %v197_v2  ;;  %200 = vst [vmem:[#allocation2 + $0xc] sm:$0xf] (!%p130_p10), %v199_v3 }
  0x16   : > { %239 = vsyncadd [#allocation3], 256 }
  0x17   : > { %962 = dma.done.wait [#allocation3], 256 }
  0x18   : > { %963 = vsyncadd [#allocation3], 4294967040  ;;  %vm351_vm0 = vcmask 130048   ;;  %s992_s6 = smov 124   ;;  %s993_s7 = smov 126   ;;  %v896_v5 = vld [vmem:[%s1178_s1 + $0x10] sm:$0xff]  }
  0x19   : > { %v331_v4 = vld [vmem:[#allocation2] sm:$0xff]  ;;  %812 = vmatprep.mubr.msk.bf16.mxu0 %vm351_vm0, %v896_v5  ;;  %v899_v8 = vld [vmem:[%s1178_s1 + $0x8] sm:$0xff]   ;;  %v336_v9 = vld [vmem:[%s1179_s2 + $0x18] sm:$0xff]  ;;  %v994_v11 = vmov 0   ;;  %vm452_vm1 = vcmask 1031168   ;;  %vm533_vm2 = vcmask 1014784  }
  0x1a   : > { %529 = vrot.lane.b32.xlu1 %v331_v4, %s992_s6  ;;  %448 = vrot.lane.b32.xlu0 %v331_v4, %s993_s7  ;;  %v332_v6 = vld [vmem:[#allocation2 + $0x8] sm:$0xff]  ;;  %v898_v7 = vld [vmem:[%s1178_s1] sm:$0xff]   ;;  %v335_v10 = vld [vmem:[%s1179_s2 + $0x10] sm:$0xff]  ;;  %s794_s19 = sshll.u32 %s982_s15, 8  ;;  %s625_s21 = sshll.u32 %s1080_s5, 4  ;;  %s1125_s21 = int_to_ptr.vmem [resolvable:$true] %s625_s21 }
  0x1b   : > { %804 = vmatprep.subr.bf16.mxu1 %v331_v4  ;;  %806 = vmatprep.mubr.msk.bf16.mxu1 %vm351_vm0, %v898_v7  ;;  %v333_v12 = vld [vmem:[%s1179_s2] sm:$0xff]  ;;  %v334_v13 = vld [vmem:[%s1179_s2 + $0x8] sm:$0xff]  ;;  %v897_v20 = vld [vmem:[%s1178_s1 + $0x18] sm:$0xff]   ;;  %s1123_s28 = scalar_lea.hbm %s1180_s3, %s794_s19  ;;  %s1131_s29 = scalar_lea.sflag [#allocation5], %s143_s26 }
  0x1c   : > { %805 = vmatpush3.bf16.msra.mxu1 %v331_v4  ;;  %895 = vset.pattern.permute.xlu1 %v994_v11  ;;  %v900_v21 = vld [vmem:[%s1178_s1 + $0x20] sm:$0xff]   ;;  %v901_v22 = vld [vmem:[%s1178_s1 + $0x28] sm:$0xff]   ;;  %s910_s15 = scalar_lea.vmem %s1125_s21, 256  ;;  %s995_s30 = smov [#allocation4]  }
  0x1d   : > { %894 = vset.pattern.permute.xlu0 %v994_v11  ;;  %p911_p11 = scmp.ne.s32.totalorder %s1125_s21, %s910_s15  ;;  %s914_s4 = sshll.u32 %s995_s30, 4  ;;  %s915_s4 = int_to_ptr.vmem [resolvable:$false] %s914_s4 }
  0x1e   : > { %531 = vrot.lane.b32.xlu1 %v332_v6, %s992_s6  ;;  %450 = vrot.lane.b32.xlu0 %v332_v6, %s993_s7  ;;  %s916_s6 = scalar_lea.vmem %s915_s4, 512  ;;  %p917_p0 = scmp.lt.s32.totalorder %s1125_s21, %s915_s4 }
  0x1f   : > { %807 = vmatmul.mubr.msk.bf16.vlgmr.msra.gmra.mrb[0].mxu1 %vm351_vm0, %v899_v8  ;;  %p912_p12 = pnand %p911_p11, %p1058_p4  ;;  %p918_p1 = scmp.lt.s32.totalorder %s916_s6, %s910_s15 }
  0x21   : > { %p913_p13 = pneg %p912_p12  ;;  %p919_p2 = por %p918_p1, %p917_p0 }
  0x22   : > { %424 = vperm.xlu1 %895, %v336_v9   ;;  %419 = vperm.xlu0 %894, %v335_v10  }
  0x23   : > { %p920_p3 = pnand %p919_p2, %p913_p13 }
  0x26   : > { %409 = vperm.xlu1 %895, %v333_v12   ;;  %414 = vperm.xlu0 %894, %v334_v13  }
  0x8c   : > { %v530_v14 = vpop.permute.xlu1 %529  ;;  %v449_v15 = vpop.permute.xlu0 %448 }
  0x90   : > { %v532_v16 = vpop.permute.xlu1 %531  ;;  %v451_v17 = vpop.permute.xlu0 %450 }
  0x91   : > { %v453_v18 = vsel %vm452_vm1, %v449_v15, %v451_v17  ;;  %v534_v19 = vsel %vm533_vm2, %v530_v14, %v532_v16 }
  0x92   : > { %810 = vmatprep.subr.bf16.mxu0 %v453_v18 }
  0x93   : > { %811 = vmatpush3.bf16.msra.mxu0 %v453_v18 }
  0x94   : > { %816 = vmatprep.subr.bf16.mxu0 %v534_v19 }
  0x96   : > { %813 = vmatmul.mubr.msk.bf16.vlgmr.msra.gmra.mrb[0].mxu0 %vm351_vm0, %v897_v20 }
  0x97   : > { %817 = vmatpush3.bf16.msra.mxu0 %v534_v19  ;;  %818 = vmatprep.mubr.msk.bf16.mxu0 %vm351_vm0, %v900_v21 }
  0xa1   : > { %v425_v27 = vpop.permute.xlu1 %424  ;;  %v420_v28 = vpop.permute.xlu0 %419 }
  0xa2   : > { %819 = vmatmul.mubr.msk.bf16.vlgmr.msra.gmra.mrb[0].mxu0 %vm351_vm0, %v901_v22 }
  0xa5   : > { %v410_v29 = vpop.permute.xlu1 %409  ;;  %v415_v32 = vpop.permute.xlu0 %414 }
  0xf2   : > { %v808_v23 = vpop.f32.mrb[0].mxu1 }
  0xf3   : > { %v392_v24 = vpop.f32.mrb[1].mxu1  ;;  %v429_v30 = vadd.f32 %v808_v23, %v420_v28 }
  0xf4   : > { %v809_v25 = vpop.f32.mrb[2].mxu1  ;;  %v427_v31 = vadd.f32 %v410_v29, %v392_v24 }
  0xf5   : > { %v395_v26 = vpop.f32.mrb[3].mxu1  ;;  %v430_v34 = vadd.f32 %v809_v25, %v425_v27 }
  0xf6   : > { %v428_v37 = vadd.f32 %v415_v32, %v395_v26 }
 0x175   : > { %v820_v33 = vpop.f32.mrb[0].mxu0 }
 0x176   : > { %v823_v35 = vadd.f32 %v820_v33, %v429_v30  ;;  %v576_v36 = vpop.f32.mrb[1].mxu0 }
 0x177   : > { %v825_v38 = vadd.f32 %v576_v36, %v427_v31  ;;  %v821_v39 = vpop.f32.mrb[2].mxu0 }
 0x178   : > { %v595_v40 = vsub.f32 0.0, %v823_v35  ;;  %v827_v41 = vadd.f32 %v821_v39, %v430_v34  ;;  %v579_v42 = vpop.f32.mrb[3].mxu0 }
 0x179   : > { %v829_v43 = vadd.f32 %v579_v42, %v428_v37 }
 0x17a   : > { %v597_v44 = vmul.f32 1.442695, %v595_v40  ;;  %v596_v45 = vsub.f32 0.0, %v827_v41 }
 0x17c   : > { %902 = vpow2.f32 %v597_v44  ;;  %v599_v46 = vmul.f32 1.442695, %v596_v45 }
 0x17e   : > { %904 = vpow2.f32 %v599_v46 }
 0x186   : > { %v903_v47 = vpop.eup %902 }
 0x187   : > { %v601_v48 = vadd.f32 1.0, %v903_v47 }
 0x188   : > { %v905_v49 = vpop.eup %904 }
 0x189   : > { %906 = vrcp.f32 %v601_v48  ;;  %v602_v50 = vadd.f32 1.0, %v905_v49 }
 0x18b   : > { %908 = vrcp.f32 %v602_v50 }
 0x193   : > { %v907_v51 = vpop.eup %906 }
 0x194   : > { %v605_v52 = vmul.f32 %v907_v51, %v825_v38 }
 0x195   : > { %v909_v53 = vpop.eup %908 }
 0x196   : > { %607 = vst [vmem:[%s1080_s5] sm:$0xff] %v605_v52  ;;  %v606_v54 = vmul.f32 %v909_v53, %v829_v43 }
 0x198   : > { %608 = vst [vmem:[%s1080_s5 + $0x8] sm:$0xff] %v606_v54 }
 0x199   : > { %923 = shalt.err (!%p920_p3)
}
 0x19a   : > { %s924_s26 = scalar_lea.hbm %s1123_s28, 256  ;;  %s928_s8 = scalar_lea.hbm %s1180_s3, 512 }
 0x19b   : > { %p925_p5 = scmp.ne.s32.totalorder %s1123_s28, %s924_s26  ;;  %p929_p9 = scmp.lt.u32.totalorder %s1123_s28, %s1180_s3 }
 0x19c   : > { %p930_p10 = scmp.lt.u32.totalorder %s928_s8, %s924_s26  ;;  %p932_p12 = scmp.lt.u32.totalorder %s924_s26, %s1123_s28 }
 0x19d   : > { %p926_p6 = pnand %p925_p5, %p1058_p4 }
 0x19e   : > { %p931_p11 = por %p930_p10, %p929_p9 }
 0x19f   : > { %p927_p7 = pneg %p926_p6 }
 0x1a0   : > { %p933_p13 = por %p932_p12, %p931_p11 }
 0x1a2   : > { %p934_p0 = pnand %p933_p13, %p927_p7 }
 0x1a4   : > { %937 = shalt.err (!%p934_p0)
}
 0x1a5   : > { %s996_s11 = smov 128   ;;  %s997_s18 = smov 8  }
 0x1a6   : > { %834 = dma.vmem_to_hbm [thread:$0]  (%p1058_p4), %s1125_s21, 256, %s1123_s28, %s1131_s29, %s996_s11, %s996_s11, %s997_s18  }
 0x1a7 PF: > { %p840_p1 = scmp.ge.s32.totalorder %s990_s17, 2  ;;  %s640_s19 = sand.u32 1, %s970_s12  }
 0x1a8   : > { %s641_s23 = scalar_lea.sflag [#allocation5], %s640_s19 }
 0x1a9   : > { %p837_p2 = pnand %p840_p1, %p1065_p8 }
 0x1ab   : > { %965 = dma.done.wait (!%p837_p2), %s641_s23, 256  }
 0x1ac   : > { %967 = vsyncadd (!%p837_p2), %s641_s23, 4294967040  ;;  %s16_s17 = sadd.s32 1, %s990_s17   ;;  %s1183_s12 = smov %s974_s13 }
 0x1ad   : > { %p13_p3 = scmp.ge.s32.totalorder %s16_s17, 4   ;;  %s1184_s13 = smov %s978_s14 }
 0x1ae   : > { %s1185_s14 = smov %s1071_s25  ;;  %s1186_s15 = smov %s986_s16 }
 0x1af   : > { %s1187_s16 = smov %s1189_s20  ;;  %15 = sbr.rel (!%p13_p3) target bundleno = 4 (0x4), region = 181 }
 0x1b6   :  { %646 = vsyncpa [#allocation5], 1 }
 0x1b7   :  { %648 = vsyncpa [#allocation5 + $0x1], 1 }
 0x1b8   :  { %649 = vsyncmov [#allocation3] }
 0x1bb   :  { %s650_s22 = vpop.sfrf %649 }
 0x1bc   :  { %p789_p4 = scmp.ne.s32.totalorder %s650_s22, 0 }
 0x1be   :  { %654 = shalt.err (%p789_p4)  }
 0x1bf   :  { %656 = vsyncmov [#allocation3 + $0x1] }
 0x1c2   :  { %s657_s24 = vpop.sfrf %656 }
 0x1c3   :  { %p790_p8 = scmp.ne.s32.totalorder %s657_s24, 0 }
 0x1c5   :  { %661 = shalt.err (%p790_p8)  }

// kernel: tpu_custom_call.1
= control target key start
LH: loop header
LB: loop body
LE: loop exit
PB: predicated region body
PF: predicated region fallthrough
CT: control target
= control target key end

     0   :  { %8 = vsyncpa [#allocation5], 0  ;;  %s1177_s0 = inlined_call_operand.vmem [shape: bf16[2,16,256], index: 0, kind: input, shape index: {}]   ;;  %s1178_s1 = inlined_call_operand.vmem [shape: bf16[3,32,16], index: 1, kind: input, shape index: {}]   ;;  %s1179_s2 = inlined_call_operand.vmem [shape: f32[32,1], index: 2, kind: input, shape index: {}]   ;;  %s1180_s3 = inlined_call_operand.hbm [shape: f32[2,16,128], index: 3, kind: output, shape index: {}]  }
   0x1   :  { %10 = vsyncpa [#allocation5 + $0x1], 0  ;;  %s1018_s12 = smov 0   ;;  %s1020_s13 = smov 0  }
   0x2   :  { %s1022_s14 = smov 0   ;;  %s1024_s15 = smov 0  }
   0x3   :  { %s1026_s16 = smov 0   ;;  %s1028_s17 = smov 0  }
   0x4 LB: > { %s747_s18 = sadd.s32 4294967295, %s990_s17   ;;  %s748_s19 = sadd.s32 4294967294, %s990_s17   ;;  %s990_s17 = sphi %s1028_s17, %s16_s17   ;;  %s986_s16 = sphi %s1026_s16, %s1187_s16   ;;  %s982_s15 = sphi %s1024_s15, %s1186_s15   ;;  %s978_s14 = sphi %s1022_s14, %s1185_s14   ;;  %s974_s13 = sphi %s1020_s13, %s1184_s13   ;;  %s970_s12 = sphi %s1018_s12, %s1183_s12  }
   0x5   : > { %s31_s20 = sadd.s32 1, %s986_s16  ;;  %s88_s21 = sadd.s32 1, %s978_s14 }
   0x6   : > { %p33_p0 = scmp.ge.s32.totalorder %s31_s20, 2  ;;  %p98_p1 = scmp.ne.s32.totalorder %s978_s14, %s974_s13 }
   0x7   : > { %p99_p2 = scmp.eq.s32.totalorder %s747_s18, 1  ;;  %p104_p3 = scmp.ne.s32.totalorder %s974_s13, %s970_s12 }
   0x8   : > { %s1189_s20 = smov (%p33_p0, %s31_s20), 0  ;;  %p105_p5 = scmp.eq.s32.totalorder %s748_s19, 1 }
   0x9   : > { %p1058_p4 = por %p99_p2, %p98_p1  ;;  %s83_s23 = ssub.s32 %s986_s16, %s1189_s20 }
   0xa   : > { %p750_p6 = scmp.ge.s32.totalorder %s990_s17, 1  ;;  %p86_p7 = scmp.eq.s32.totalorder %s83_s23, 0 }
   0xb   : > { %p1065_p8 = por %p105_p5, %p104_p3  ;;  %p129_p9 = scmp.lt.s32.totalorder %s990_s17, 3 }
   0xc   : > { %s1071_s25 = scalar_select %p86_p7, %s978_s14, %s88_s21  }
   0xd   : > { %p130_p10 = pnand %p750_p6, %p129_p9 }
   0xe   : > { %s143_s26 = sand.u32 (!%p130_p10), 1, %s974_s13   ;;  %s791_s27 = sshll.u32 (!%p130_p10), %s982_s15, 4 }
   0xf   : > { %133 = sbr.rel (%p130_p10) target bundleno = 423 (0x1a7), region = 28  ;;  %s751_s28 = sshll.u32 (!%p130_p10), %s143_s26, 4 }
  0x10   : > { %s171_s4 = scalar_lea.vmem (!%p130_p10), %s1177_s0, %s791_s27  ;;  %s1080_s5 = scalar_lea.vmem (!%p130_p10), [#allocation4], %s751_s28 }
  0x11   : > { %v193_v0 = vld [vmem:[%s171_s4] sm:$0xf] (!%p130_p10)  ;;  %v195_v1 = vld [vmem:[%s171_s4 + $0x8] sm:$0xf] (!%p130_p10)  ;;  %v197_v2 = vld [vmem:[%s171_s4 + $0x4] sm:$0xf] (!%p130_p10) }
  0x12   : > { %194 = vst [vmem:[#allocation2] sm:$0xf] (!%p130_p10), %v193_v0  ;;  %196 = vst [vmem:[#allocation2 + $0x4] sm:$0xf] (!%p130_p10), %v195_v1  ;;  %v199_v3 = vld [vmem:[%s171_s4 + $0xc] sm:$0xf] (!%p130_p10) }
  0x13   : > { %198 = vst [vmem:[#allocation2 + $0x8] sm:$0xf] (!%p130_p10), %v197_v2  ;;  %200 = vst [vmem:[#allocation2 + $0xc] sm:$0xf] (!%p130_p10), %v199_v3 }
  0x16   : > { %239 = vsyncadd [#allocation3], 256 }
  0x17   : > { %962 = dma.done.wait [#allocation3], 256 }
  0x18   : > { %963 = vsyncadd [#allocation3], 4294967040  ;;  %vm351_vm0 = vcmask 130048   ;;  %s992_s6 = smov 124   ;;  %s993_s7 = smov 126   ;;  %v896_v5 = vld [vmem:[%s1178_s1 + $0x10] sm:$0xff]  }
  0x19   : > { %v331_v4 = vld [vmem:[#allocation2] sm:$0xff]  ;;  %812 = vmatprep.mubr.msk.bf16.mxu0 %vm351_vm0, %v896_v5  ;;  %v899_v8 = vld [vmem:[%s1178_s1 + $0x8] sm:$0xff]   ;;  %v336_v9 = vld [vmem:[%s1179_s2 + $0x18] sm:$0xff]  ;;  %v994_v11 = vmov 0   ;;  %vm452_vm1 = vcmask 1031168   ;;  %vm533_vm2 = vcmask 1014784  }
  0x1a   : > { %529 = vrot.lane.b32.xlu1 %v331_v4, %s992_s6  ;;  %448 = vrot.lane.b32.xlu0 %v331_v4, %s993_s7  ;;  %v332_v6 = vld [vmem:[#allocation2 + $0x8] sm:$0xff]  ;;  %v898_v7 = vld [vmem:[%s1178_s1] sm:$0xff]   ;;  %v335_v10 = vld [vmem:[%s1179_s2 + $0x10] sm:$0xff]  ;;  %s794_s19 = sshll.u32 %s982_s15, 8  ;;  %s625_s21 = sshll.u32 %s1080_s5, 4  ;;  %s1125_s21 = int_to_ptr.vmem [resolvable:$true] %s625_s21 }
  0x1b   : > { %804 = vmatprep.subr.bf16.mxu1 %v331_v4  ;;  %806 = vmatprep.mubr.msk.bf16.mxu1 %vm351_vm0, %v898_v7  ;;  %v333_v12 = vld [vmem:[%s1179_s2] sm:$0xff]  ;;  %v334_v13 = vld [vmem:[%s1179_s2 + $0x8] sm:$0xff]  ;;  %v897_v20 = vld [vmem:[%s1178_s1 + $0x18] sm:$0xff]   ;;  %s1123_s28 = scalar_lea.hbm %s1180_s3, %s794_s19  ;;  %s1131_s29 = scalar_lea.sflag [#allocation5], %s143_s26 }
  0x1c   : > { %805 = vmatpush3.bf16.msra.mxu1 %v331_v4  ;;  %895 = vset.pattern.permute.xlu1 %v994_v11  ;;  %v900_v21 = vld [vmem:[%s1178_s1 + $0x20] sm:$0xff]   ;;  %v901_v22 = vld [vmem:[%s1178_s1 + $0x28] sm:$0xff]   ;;  %s910_s15 = scalar_lea.vmem %s1125_s21, 256  ;;  %s995_s30 = smov [#allocation4]  }
  0x1d   : > { %894 = vset.pattern.permute.xlu0 %v994_v11  ;;  %p911_p11 = scmp.ne.s32.totalorder %s1125_s21, %s910_s15  ;;  %s914_s4 = sshll.u32 %s995_s30, 4  ;;  %s915_s4 = int_to_ptr.vmem [resolvable:$false] %s914_s4 }
  0x1e   : > { %531 = vrot.lane.b32.xlu1 %v332_v6, %s992_s6  ;;  %450 = vrot.lane.b32.xlu0 %v332_v6, %s993_s7  ;;  %s916_s6 = scalar_lea.vmem %s915_s4, 512  ;;  %p917_p0 = scmp.lt.s32.totalorder %s1125_s21, %s915_s4 }
  0x1f   : > { %807 = vmatmul.mubr.msk.bf16.vlgmr.msra.gmra.mrb[0].mxu1 %vm351_vm0, %v899_v8  ;;  %p912_p12 = pnand %p911_p11, %p1058_p4  ;;  %p918_p1 = scmp.lt.s32.totalorder %s916_s6, %s910_s15 }
  0x21   : > { %p913_p13 = pneg %p912_p12  ;;  %p919_p2 = por %p918_p1, %p917_p0 }
  0x22   : > { %424 = vperm.xlu1 %895, %v336_v9   ;;  %419 = vperm.xlu0 %894, %v335_v10  }
  0x23   : > { %p920_p3 = pnand %p919_p2, %p913_p13 }
  0x26   : > { %409 = vperm.xlu1 %895, %v333_v12   ;;  %414 = vperm.xlu0 %894, %v334_v13  }
  0x8c   : > { %v530_v14 = vpop.permute.xlu1 %529  ;;  %v449_v15 = vpop.permute.xlu0 %448 }
  0x90   : > { %v532_v16 = vpop.permute.xlu1 %531  ;;  %v451_v17 = vpop.permute.xlu0 %450 }
  0x91   : > { %v453_v18 = vsel %vm452_vm1, %v449_v15, %v451_v17  ;;  %v534_v19 = vsel %vm533_vm2, %v530_v14, %v532_v16 }
  0x92   : > { %810 = vmatprep.subr.bf16.mxu0 %v453_v18 }
  0x93   : > { %811 = vmatpush3.bf16.msra.mxu0 %v453_v18 }
  0x94   : > { %816 = vmatprep.subr.bf16.mxu0 %v534_v19 }
  0x96   : > { %813 = vmatmul.mubr.msk.bf16.vlgmr.msra.gmra.mrb[0].mxu0 %vm351_vm0, %v897_v20 }
  0x97   : > { %817 = vmatpush3.bf16.msra.mxu0 %v534_v19  ;;  %818 = vmatprep.mubr.msk.bf16.mxu0 %vm351_vm0, %v900_v21 }
  0xa1   : > { %v425_v27 = vpop.permute.xlu1 %424  ;;  %v420_v28 = vpop.permute.xlu0 %419 }
  0xa2   : > { %819 = vmatmul.mubr.msk.bf16.vlgmr.msra.gmra.mrb[0].mxu0 %vm351_vm0, %v901_v22 }
  0xa5   : > { %v410_v29 = vpop.permute.xlu1 %409  ;;  %v415_v32 = vpop.permute.xlu0 %414 }
  0xf2   : > { %v808_v23 = vpop.f32.mrb[0].mxu1 }
  0xf3   : > { %v392_v24 = vpop.f32.mrb[1].mxu1  ;;  %v429_v30 = vadd.f32 %v808_v23, %v420_v28 }
  0xf4   : > { %v809_v25 = vpop.f32.mrb[2].mxu1  ;;  %v427_v31 = vadd.f32 %v410_v29, %v392_v24 }
  0xf5   : > { %v395_v26 = vpop.f32.mrb[3].mxu1  ;;  %v430_v34 = vadd.f32 %v809_v25, %v425_v27 }
  0xf6   : > { %v428_v37 = vadd.f32 %v415_v32, %v395_v26 }
 0x175   : > { %v820_v33 = vpop.f32.mrb[0].mxu0 }
 0x176   : > { %v823_v35 = vadd.f32 %v820_v33, %v429_v30  ;;  %v576_v36 = vpop.f32.mrb[1].mxu0 }
 0x177   : > { %v825_v38 = vadd.f32 %v576_v36, %v427_v31  ;;  %v821_v39 = vpop.f32.mrb[2].mxu0 }
 0x178   : > { %v595_v40 = vsub.f32 0.0, %v823_v35  ;;  %v827_v41 = vadd.f32 %v821_v39, %v430_v34  ;;  %v579_v42 = vpop.f32.mrb[3].mxu0 }
 0x179   : > { %v829_v43 = vadd.f32 %v579_v42, %v428_v37 }
 0x17a   : > { %v597_v44 = vmul.f32 1.442695, %v595_v40  ;;  %v596_v45 = vsub.f32 0.0, %v827_v41 }
 0x17c   : > { %902 = vpow2.f32 %v597_v44  ;;  %v599_v46 = vmul.f32 1.442695, %v596_v45 }
 0x17e   : > { %904 = vpow2.f32 %v599_v46 }
 0x186   : > { %v903_v47 = vpop.eup %902 }
 0x187   : > { %v601_v48 = vadd.f32 1.0, %v903_v47 }
 0x188   : > { %v905_v49 = vpop.eup %904 }
 0x189   : > { %906 = vrcp.f32 %v601_v48  ;;  %v602_v50 = vadd.f32 1.0, %v905_v49 }
 0x18b   : > { %908 = vrcp.f32 %v602_v50 }
 0x193   : > { %v907_v51 = vpop.eup %906 }
 0x194   : > { %v605_v52 = vmul.f32 %v907_v51, %v825_v38 }
 0x195   : > { %v909_v53 = vpop.eup %908 }
 0x196   : > { %607 = vst [vmem:[%s1080_s5] sm:$0xff] %v605_v52  ;;  %v606_v54 = vmul.f32 %v909_v53, %v829_v43 }
 0x198   : > { %608 = vst [vmem:[%s1080_s5 + $0x8] sm:$0xff] %v606_v54 }
 0x199   : > { %923 = shalt.err (!%p920_p3)
}
 0x19a   : > { %s924_s26 = scalar_lea.hbm %s1123_s28, 256  ;;  %s928_s8 = scalar_lea.hbm %s1180_s3, 512 }
 0x19b   : > { %p925_p5 = scmp.ne.s32.totalorder %s1123_s28, %s924_s26  ;;  %p929_p9 = scmp.lt.u32.totalorder %s1123_s28, %s1180_s3 }
 0x19c   : > { %p930_p10 = scmp.lt.u32.totalorder %s928_s8, %s924_s26  ;;  %p932_p12 = scmp.lt.u32.totalorder %s924_s26, %s1123_s28 }
 0x19d   : > { %p926_p6 = pnand %p925_p5, %p1058_p4 }
 0x19e   : > { %p931_p11 = por %p930_p10, %p929_p9 }
 0x19f   : > { %p927_p7 = pneg %p926_p6 }
 0x1a0   : > { %p933_p13 = por %p932_p12, %p931_p11 }
 0x1a2   : > { %p934_p0 = pnand %p933_p13, %p927_p7 }
 0x1a4   : > { %937 = shalt.err (!%p934_p0)
}
 0x1a5   : > { %s996_s11 = smov 128   ;;  %s997_s18 = smov 8  }
 0x1a6   : > { %834 = dma.vmem_to_hbm [thread:$0]  (%p1058_p4), %s1125_s21, 256, %s1123_s28, %s1131_s29, %s996_s11, %s996_s11, %s997_s18  }
 0x1a7 PF: > { %p840_p1 = scmp.ge.s32.totalorder %s990_s17, 2  ;;  %s640_s19 = sand.u32 1, %s970_s12  }
 0x1a8   : > { %s641_s23 = scalar_lea.sflag [#allocation5], %s640_s19 }
 0x1a9   : > { %p837_p2 = pnand %p840_p1, %p1065_p8 }
 0x1ab   : > { %965 = dma.done.wait (!%p837_p2), %s641_s23, 256  }
 0x1ac   : > { %967 = vsyncadd (!%p837_p2), %s641_s23, 4294967040  ;;  %s16_s17 = sadd.s32 1, %s990_s17   ;;  %s1183_s12 = smov %s974_s13 }
 0x1ad   : > { %p13_p3 = scmp.ge.s32.totalorder %s16_s17, 4   ;;  %s1184_s13 = smov %s978_s14 }
 0x1ae   : > { %s1185_s14 = smov %s1071_s25  ;;  %s1186_s15 = smov %s986_s16 }
 0x1af   : > { %s1187_s16 = smov %s1189_s20  ;;  %15 = sbr.rel (!%p13_p3) target bundleno = 4 (0x4), region = 181 }
 0x1b6   :  { %646 = vsyncpa [#allocation5], 1 }
 0x1b7   :  { %648 = vsyncpa [#allocation5 + $0x1], 1 }
 0x1b8   :  { %649 = vsyncmov [#allocation3] }
 0x1bb   :  { %s650_s22 = vpop.sfrf %649 }
 0x1bc   :  { %p789_p4 = scmp.ne.s32.totalorder %s650_s22, 0 }
 0x1be   :  { %654 = shalt.err (%p789_p4)  }
 0x1bf   :  { %656 = vsyncmov [#allocation3 + $0x1] }
 0x1c2   :  { %s657_s24 = vpop.sfrf %656 }
 0x1c3   :  { %p790_p8 = scmp.ne.s32.totalorder %s657_s24, 0 }
 0x1c5   :  { %661 = shalt.err (%p790_p8)  }

</bundles_post_ra>
